<compile_context>
chip_gen: v7x
topology: tpu7x:2x2x1
jax: 0.10.0
libtpu: 0.0.40
codegen_flags: <defaults>
</compile_context>

<pallas_src>
import functools

import jax
import jax.numpy as jnp
import numpy as np
from jax.experimental import pallas as pl
from jax.experimental.pallas import tpu as pltpu


# ---------------------------------------------------------------------------
# Kernel: grid = (2, nk).  p = program_id(0) selects which input this step
# belongs to; the corresponding D-chunk is (optionally tail-masked and)
# accumulated as x @ x.T into the resident (1, B, B) f32 output block for p.
# ---------------------------------------------------------------------------
def _fused_gram_kernel(x1_ref, x2_ref, g_ref, *, d1, d2, bw1, bw2, nk1, nk2):
    p = pl.program_id(0)
    k = pl.program_id(1)

    @pl.when(k == 0)
    def _():
        g_ref[...] = jnp.zeros_like(g_ref)

    def accum(x_ref, d, bw):
        x = x_ref[...]                                   # (B, bw), native dtype
        if d % bw:  # ragged tail handled in-kernel: mask overhang columns
            col = jax.lax.broadcasted_iota(jnp.int32, x.shape, 1) + k * bw
            x = jnp.where(col < d, x, jnp.zeros_like(x))
        g = jax.lax.dot_general(                         # (B, B) f32 on the MXU
            x, x,
            dimension_numbers=(((1,), (1,)), ((), ())),  # contract feature dim
            preferred_element_type=jnp.float32,
            precision=jax.lax.Precision.HIGHEST,
        )
        g_ref[...] += g[None, :, :]

    @pl.when((p == 0) & (k < nk1))
    def _():
        accum(x1_ref, d1, bw1)

    @pl.when((p == 1) & (k < nk2))
    def _():
        accum(x2_ref, d2, bw2)


def _vmem_capacity_bytes():
    try:
        return int(pltpu.get_tpu_info().vmem_capacity_bytes)
    except Exception:
        return 64 << 20  # v7x-safe fallback if the query is unavailable


def _block_width_cap(batch, itemsize, block_cap):
    """Largest 128-multiple chunk width whose double-buffered input slabs
    (2 inputs x 2 buffers) fit a per-generation VMEM budget."""
    # 48 MiB on v5e/v6e (128 MiB physical), 32 MiB on v7x (64 MiB physical).
    vmem_limit = min(_vmem_capacity_bytes() // 2, 48 << 20)
    slab_budget = vmem_limit // 3          # headroom for outputs / compiler temps
    cap = max((slab_budget // (4 * batch * itemsize)) // 128 * 128, 128)
    if block_cap is not None:              # test/override hook
        cap = max((int(block_cap) // 128) * 128, 128)
    return cap, vmem_limit


def diff_loss(input1, input2, *, block_cap=None):
    """Pallas TPU implementation of DiffLoss.forward (returns a scalar f32)."""
    B = input1.shape[0]
    x1 = input1.reshape(B, -1)   # keep native dtype (f32 or bf16); f32 accumulate
    x2 = input2.reshape(B, -1)
    d1, d2 = x1.shape[1], x2.shape[1]
    itemsize = max(x1.dtype.itemsize, x2.dtype.itemsize)

    bw_cap, vmem_limit = _block_width_cap(B, itemsize, block_cap)
    bw1 = d1 if d1 <= bw_cap else bw_cap     # full-extent block when it fits
    bw2 = d2 if d2 <= bw_cap else bw_cap
    nk1 = pl.cdiv(d1, bw1)
    nk2 = pl.cdiv(d2, bw2)
    nk = max(nk1, nk2)

    # Leading grid axis selects {x1, x2}.  The inactive input's block index is
    # held constant (arithmetic-only maps), so no redundant DMA is issued.
    def x1_index(p, k):
        return (0, jnp.minimum(k, nk1 - 1) * (1 - p) + (nk1 - 1) * p)

    def x2_index(p, k):
        return (0, jnp.minimum(k, nk2 - 1) * p)

    kernel = functools.partial(
        _fused_gram_kernel, d1=d1, d2=d2, bw1=bw1, bw2=bw2, nk1=nk1, nk2=nk2)

    cost = pl.CostEstimate(
        flops=2 * B * B * (d1 + d2),
        transcendentals=0,
        bytes_accessed=B * (d1 + d2) * itemsize + 2 * B * B * 4,
    )

    grams = pl.pallas_call(
        kernel,
        out_shape=jax.ShapeDtypeStruct((2, B, B), jnp.float32),
        grid_spec=pltpu.PrefetchScalarGridSpec(
            num_scalar_prefetch=0,
            grid=(2, nk),
            in_specs=[pl.BlockSpec((B, bw1), x1_index),
                      pl.BlockSpec((B, bw2), x2_index)],
            out_specs=pl.BlockSpec((1, B, B), lambda p, k: (p, 0, 0)),
        ),
        compiler_params=pltpu.CompilerParams(
            dimension_semantics=("parallel", "arbitrary"),
            vmem_limit_bytes=vmem_limit,
        ),
        cost_estimate=cost,
    )(x1, x2)

    # O(B^2) epilogue (tiny, XLA-fused): norms come from the Gram diagonals so
    # they stay self-consistent with the off-diagonal entries.
    g1, g2 = grams[0], grams[1]
    s1 = 1.0 / (jnp.sqrt(jnp.diagonal(g1)) + 1e-6)
    s2 = 1.0 / (jnp.sqrt(jnp.diagonal(g2)) + 1e-6)
    g1n = g1 * (s1[:, None] * s1[None, :])
    g2n = g2 * (s2[:, None] * s2[None, :])
    inv_count = (1.0 / float(d1)) / float(d2)   # exact in f64 at trace time
    return jnp.sum(g1n * g2n) * np.float32(inv_count)


# ---------------------------------------------------------------------------
# Trustworthy reference: float64 NumPy mirror of the PyTorch forward.
# ---------------------------------------------------------------------------
def _diff_loss_ref_f64(input1, input2):
    B = input1.shape[0]
    x1 = np.asarray(jnp.asarray(input1, dtype=jnp.float32), dtype=np.float64).reshape(B, -1)
    x2 = np.asarray(jnp.asarray(input2, dtype=jnp.float32), dtype=np.float64).reshape(B, -1)
    n1 = np.linalg.norm(x1, axis=1, keepdims=True)
    n2 = np.linalg.norm(x2, axis=1, keepdims=True)
    x1n = x1 / (n1 + 1e-6)
    x2n = x2 / (n2 + 1e-6)
    return float(np.mean((x1n.T @ x2n) ** 2))


if __name__ == "__main__":
    key = jax.random.PRNGKey(0)
    k1, k2, k3, k4 = jax.random.split(key, 4)

    loss_fn = jax.jit(diff_loss, static_argnames=("block_cap",))

    # NCHW feature maps, as the PyTorch module receives them.
    a1 = jax.random.normal(k1, (2, 4, 16, 16), dtype=jnp.float32)   # D = 1024
    b1 = jax.random.normal(k2, (2, 4, 16, 16), dtype=jnp.float32)
    a2 = jax.random.normal(k3, (2, 5, 12, 12), dtype=jnp.float32)   # D = 720
    b2 = jax.random.normal(k4, (2, 5, 12, 12), dtype=jnp.float32)

    cases = [
        ((a1, b1), None, 1e-4),   # auto tile: one full-width block per input
        ((a2, b2), None, 1e-4),   # D=720: full-extent block, no pad / no mask
        ((a2, b2), 256, 1e-4),    # forced multi-chunk path + ragged-tail mask
        ((a2, b1), 256, 1e-4),    # d1 != d2: per-input chunk counts + clamped maps
        ((a1.astype(jnp.bfloat16), b1.astype(jnp.bfloat16)), None, 2e-2),  # bf16
    ]
    for (a, b), cap, tol in cases:
        out = jax.block_until_ready(loss_fn(a, b, block_cap=cap))
        ref = _diff_loss_ref_f64(a, b)
        rel = abs(float(out) - ref) / max(abs(ref), 1e-30)
        assert rel < tol, (float(out), ref, rel, cap)

    print("KERNEL_OK")
</pallas_src>

<mosaic_0001>
module attributes {stable_mosaic.version = 11 : i64} {
  func.func @_fused_gram_kernel(%arg0: i32, %arg1: i32, %arg2: memref<2x1024xf32, #tpu.memory_space<vmem>>, %arg3: memref<2x1024xf32, #tpu.memory_space<vmem>>, %arg4: memref<1x2x2xf32, #tpu.memory_space<vmem>>) attributes {dimension_semantics = [#tpu.dimension_semantics<parallel>, #tpu.dimension_semantics<arbitrary>], iteration_bounds = array<i64: 2, 1>, scalar_prefetch = 0 : i64, scratch_operands = 0 : i64, tpu.core_type = #tpu.core_type<tc>, window_params = [{transform_indices = @transform_0, window_bounds = array<i64: 2, 1024>}, {transform_indices = @transform_1, window_bounds = array<i64: 2, 1024>}, {transform_indices = @transform_2, window_bounds = array<i64: 1, 2, 2>}]} {
    %c0_i32 = arith.constant 0 : i32
    %0 = arith.cmpi eq, %arg1, %c0_i32 : i32
    %1 = arith.extui %0 : i1 to i32
    %c0_i32_0 = arith.constant 0 : i32
    %2 = arith.cmpi ne, %1, %c0_i32_0 : i32
    scf.if %2 {
      %cst = arith.constant 0.000000e+00 : f32
      %13 = vector.broadcast %cst : f32 to vector<1x2x2xf32>
      %c0 = arith.constant 0 : index
      %c0_6 = arith.constant 0 : index
      %c0_7 = arith.constant 0 : index
      %14 = vector.load %arg4[%c0, %c0_6, %c0_7] : memref<1x2x2xf32, #tpu.memory_space<vmem>>, vector<1x2x2xf32>
      tpu.vector_store %arg4[%c0, %c0_6, %c0_7], %13 {strides = array<i32>} : memref<1x2x2xf32, #tpu.memory_space<vmem>>, vector<1x2x2xf32>,
    } else {
    }
    %c0_i32_1 = arith.constant 0 : i32
    %3 = arith.cmpi eq, %arg0, %c0_i32_1 : i32
    %c1_i32 = arith.constant 1 : i32
    %4 = arith.cmpi slt, %arg1, %c1_i32 : i32
    %5 = arith.andi %3, %4 : i1
    %6 = arith.extui %5 : i1 to i32
    %c0_i32_2 = arith.constant 0 : i32
    %7 = arith.cmpi ne, %6, %c0_i32_2 : i32
    scf.if %7 {
      %c0 = arith.constant 0 : index
      %c0_6 = arith.constant 0 : index
      %13 = vector.load %arg2[%c0, %c0_6] : memref<2x1024xf32, #tpu.memory_space<vmem>>, vector<2x1024xf32>
      %cst = arith.constant dense<0.000000e+00> : vector<2x2xf32>
      %14 = tpu.matmul %13, %13, %cst {dimension_numbers = #tpu.dot_dimension_numbers<[1], [1], [0], [0], [0, 0, 1, 0], [], []>, precision = #tpu.contract_precision<fp32>} : vector<2x1024xf32>, vector<2x1024xf32>, vector<2x2xf32> -> vector<2x2xf32>
      %c0_7 = arith.constant 0 : index
      %c0_8 = arith.constant 0 : index
      %c0_9 = arith.constant 0 : index
      %15 = vector.load %arg4[%c0_7, %c0_8, %c0_9] : memref<1x2x2xf32, #tpu.memory_space<vmem>>, vector<1x2x2xf32>
      %16 = vector.shape_cast %14 : vector<2x2xf32> to vector<1x2x2xf32>
      %17 = arith.addf %15, %16 : vector<1x2x2xf32>
      %c0_10 = arith.constant 0 : index
      %c0_11 = arith.constant 0 : index
      %c0_12 = arith.constant 0 : index
      %18 = vector.load %arg4[%c0_10, %c0_11, %c0_12] : memref<1x2x2xf32, #tpu.memory_space<vmem>>, vector<1x2x2xf32>
      tpu.vector_store %arg4[%c0_10, %c0_11, %c0_12], %17 {strides = array<i32>} : memref<1x2x2xf32, #tpu.memory_space<vmem>>, vector<1x2x2xf32>,
    } else {
    }
    %c1_i32_3 = arith.constant 1 : i32
    %8 = arith.cmpi eq, %arg0, %c1_i32_3 : i32
    %c1_i32_4 = arith.constant 1 : i32
    %9 = arith.cmpi slt, %arg1, %c1_i32_4 : i32
    %10 = arith.andi %8, %9 : i1
    %11 = arith.extui %10 : i1 to i32
    %c0_i32_5 = arith.constant 0 : i32
    %12 = arith.cmpi ne, %11, %c0_i32_5 : i32
    scf.if %12 {
      %c0 = arith.constant 0 : index
      %c0_6 = arith.constant 0 : index
      %13 = vector.load %arg3[%c0, %c0_6] : memref<2x1024xf32, #tpu.memory_space<vmem>>, vector<2x1024xf32>
      %cst = arith.constant dense<0.000000e+00> : vector<2x2xf32>
      %14 = tpu.matmul %13, %13, %cst {dimension_numbers = #tpu.dot_dimension_numbers<[1], [1], [0], [0], [0, 0, 1, 0], [], []>, precision = #tpu.contract_precision<fp32>} : vector<2x1024xf32>, vector<2x1024xf32>, vector<2x2xf32> -> vector<2x2xf32>
      %c0_7 = arith.constant 0 : index
      %c0_8 = arith.constant 0 : index
      %c0_9 = arith.constant 0 : index
      %15 = vector.load %arg4[%c0_7, %c0_8, %c0_9] : memref<1x2x2xf32, #tpu.memory_space<vmem>>, vector<1x2x2xf32>
      %16 = vector.shape_cast %14 : vector<2x2xf32> to vector<1x2x2xf32>
      %17 = arith.addf %15, %16 : vector<1x2x2xf32>
      %c0_10 = arith.constant 0 : index
      %c0_11 = arith.constant 0 : index
      %c0_12 = arith.constant 0 : index
      %18 = vector.load %arg4[%c0_10, %c0_11, %c0_12] : memref<1x2x2xf32, #tpu.memory_space<vmem>>, vector<1x2x2xf32>
      tpu.vector_store %arg4[%c0_10, %c0_11, %c0_12], %17 {strides = array<i32>} : memref<1x2x2xf32, #tpu.memory_space<vmem>>, vector<1x2x2xf32>,
    } else {
    }
    return
  }
  func.func @transform_0(%arg0: i32, %arg1: i32) -> (i32, i32) {
    %c0_i32 = arith.constant 0 : i32
    %0 = arith.minsi %arg1, %c0_i32 : i32
    %c1_i32 = arith.constant 1 : i32
    %1 = arith.subi %c1_i32, %arg0 : i32
    %2 = arith.muli %0, %1 : i32
    %c0_i32_0 = arith.constant 0 : i32
    %3 = arith.muli %c0_i32_0, %arg0 : i32
    %4 = arith.addi %2, %3 : i32
    %c0_i32_1 = arith.constant 0 : i32
    %c0_i32_2 = arith.constant 0 : i32
    return %c0_i32_1, %4 : i32, i32
  }
  func.func @transform_1(%arg0: i32, %arg1: i32) -> (i32, i32) {
    %c0_i32 = arith.constant 0 : i32
    %0 = arith.minsi %arg1, %c0_i32 : i32
    %1 = arith.muli %0, %arg0 : i32
    %c0_i32_0 = arith.constant 0 : i32
    %c0_i32_1 = arith.constant 0 : i32
    return %c0_i32_0, %1 : i32, i32
  }
  func.func @transform_2(%arg0: i32, %arg1: i32) -> (i32, i32, i32) {
    %c0_i32 = arith.constant 0 : i32
    %c0_i32_0 = arith.constant 0 : i32
    %c0_i32_1 = arith.constant 0 : i32
    return %arg0, %c0_i32, %c0_i32_0 : i32, i32, i32
  }
}

</mosaic_0001>

<bundles_post_ra>
// kernel: diff_loss.1
= control target key start
LH: loop header
LB: loop body
LE: loop exit
PB: predicated region body
PF: predicated region fallthrough
CT: control target
= control target key end

     0   :  { %s4280_s9 = smov 0   ;;  %s4282_s10 = smov 0   ;;  %s4446_s0 = inlined_call_operand.vmem [shape: f32[2,1024], index: 0, kind: input, shape index: {}]   ;;  %s4447_s1 = inlined_call_operand.vmem [shape: f32[2,1024], index: 1, kind: input, shape index: {}]   ;;  %s4448_s2 = inlined_call_operand.vmem [shape: f32[2,2,2], index: 2, kind: output, shape index: {}]  }
   0x1   :  { %s4284_s11 = smov 0  }
   0x2 LB: > { %s24_s12 = sadd.s32 1, %s4256_s10  ;;  %p4199_p0 = scmp.ge.s32.totalorder %s4260_s11, 1  ;;  %s4260_s11 = sphi %s4284_s11, %s12_s11   ;;  %s4256_s10 = sphi %s4282_s10, %s4450_s10   ;;  %s4252_s9 = sphi %s4280_s9, %s4449_s9  }
   0x3   : > { %p26_p1 = scmp.ge.s32.totalorder %s24_s12, 2  ;;  %p164_p2 = scmp.lt.s32.totalorder %s4260_s11, 3 }
   0x5   : > { %s4452_s12 = smov (%p26_p1, %s24_s12), 0  ;;  %p165_p3 = pnand %p4199_p0, %p164_p2 }
   0x6   : > { %p223_p4 = scmp.lt.s32.totalorder (!%p165_p3), %s4252_s9, 1  ;;  %p233_p5 = scmp.eq.s32.totalorder (!%p165_p3), %s4252_s9, 0  ;;  %vm231_vm0 = vcmask (!%p165_p3), 9216   ;;  %v4262_v0 = vmov (!%p165_p3), 0.0  }
   0x7   : > { %168 = sbr.rel (%p165_p3) target bundleno = 588 (0x24c), region = 28 }
   0xe   : > { %s224_s13 = scalar_select %p223_p4, %s4252_s9, 1 }
   0xf   : > { %238 = sbr.rel (!%p233_p5) target bundleno = 301 (0x12d), region = 36  ;;  %v247_v1 = vlaneseq (%p233_p5)  ;;  %v4263_v2 = vmov (%p233_p5), 1983009808   ;;  %v239_v4 = vld [vmem:[%s4446_s0] sm:$0xff] (%p233_p5)  ;;  %v240_v19 = vld [vmem:[%s4446_s0 + $0x8] sm:$0xff] (%p233_p5) }
  0x10   : > { %s4200_s14 = sshll.u32 %s224_s13, 1  ;;  %v245_v3 = vunpack.c.l.s4 (%p233_p5), %v4263_v2  ;;  %v243_v7 = vcombine.high (%p233_p5), %v239_v4, %v239_v4  ;;  %v260_v34 = vcombine.high (%p233_p5), %v240_v19, %v240_v19 }
  0x11   : > { %s4306_s17 = scalar_lea.vmem %s4448_s2, %s4200_s14  ;;  %v248_v5 = vshrl.u32 (%p233_p5), %v247_v1, 7 }
  0x12   : > { %232 = vst.msk [vmem:[%s4306_s17] sm:$0x3] %vm231_vm0, %v4262_v0  ;;  %v246_v6 = vunpack.c.0.s8 (%p233_p5), %v245_v3 }
  0x14   : > { %v249_v8 = vsub.s32 (%p233_p5), %v246_v6, %v248_v5 }
  0x16   : > { %v250_v9 = vrot.slane %v239_v4, %v249_v8  ;;  %v257_v10 = vrot.slane %v243_v7, %v249_v8  ;;  %v267_v24 = vrot.slane %v240_v19, %v249_v8  ;;  %v274_v39 = vrot.slane %v260_v34, %v249_v8 }
  0x18   : > { %v258_v11 = vcombine.high %v250_v9, %v250_v9  ;;  %v287_v12 = vand.u32 4294901760, %v250_v9  ;;  %v259_v13 = vcombine.high %v257_v10, %v257_v10  ;;  %v4318_v20 = vand.u32 4294901760, %v257_v10 }
  0x19   : > { %v275_v30 = vcombine.high %v267_v24, %v267_v24  ;;  %v4324_v36 = vand.u32 4294901760, %v267_v24  ;;  %v276_v43 = vcombine.high %v274_v39, %v274_v39  ;;  %v4336_v48 = vand.u32 4294901760, %v274_v39 }
  0x1a   : > { %v285_v14 = vand.u32 4294901760, %v258_v11  ;;  %v358_v15 = vsub.f32 %v250_v9, %v287_v12  ;;  %v4313_v16 = vand.u32 4294901760, %v259_v13  ;;  %v830_v27 = vsub.f32 %v257_v10, %v4318_v20 }
  0x1b   : > { %v4322_v33 = vand.u32 4294901760, %v275_v30  ;;  %v1302_v41 = vsub.f32 %v267_v24, %v4324_v36  ;;  %v4332_v46 = vand.u32 4294901760, %v276_v43  ;;  %v1774_v52 = vsub.f32 %v274_v39, %v4336_v48 }
  0x1c   : > { %286 = vmatprep.subr.mxu0 %v285_v14  ;;  %v352_v17 = vsub.f32 %v258_v11, %v285_v14  ;;  %v359_v18 = vand.u32 4294901760, %v358_v15  ;;  %442 = vmatprep.mubr.f32.mxu1 %v285_v14  ;;  %v824_v23 = vsub.f32 %v259_v13, %v4313_v16  ;;  %v831_v31 = vand.u32 4294901760, %v830_v27 }
  0x1d   : > { %288 = vmatpush1.xpose.msra.mxu0 %v287_v12  ;;  %v1296_v38 = vsub.f32 %v275_v30, %v4322_v33  ;;  %v1303_v44 = vand.u32 4294901760, %v1302_v41  ;;  %v1768_v50 = vsub.f32 %v276_v43, %v4332_v46  ;;  %v1775_v54 = vand.u32 4294901760, %v1774_v52 }
  0x1e   : > { %v353_v21 = vand.u32 4294901760, %v352_v17  ;;  %v360_v22 = vsub.f32 %v358_v15, %v359_v18  ;;  %451 = vmatprep.subr.mxu0 %v352_v17  ;;  %v825_v29 = vand.u32 4294901760, %v824_v23  ;;  %v832_v35 = vsub.f32 %v830_v27, %v831_v31 }
  0x1f   : > { %v1297_v42 = vand.u32 4294901760, %v1296_v38  ;;  %v1304_v47 = vsub.f32 %v1302_v41, %v1303_v44  ;;  %v1769_v53 = vand.u32 4294901760, %v1768_v50  ;;  %v1776_v56 = vsub.f32 %v1774_v52, %v1775_v54 }
  0x20   : > { %v354_v25 = vsub.f32 %v352_v17, %v353_v21  ;;  %v361_v26 = vand.u32 4294901760, %v360_v22  ;;  %v826_v32 = vsub.f32 %v824_v23, %v825_v29  ;;  %v833_v40 = vand.u32 4294901760, %v832_v35 }
  0x21   : > { %v1298_v45 = vsub.f32 %v1296_v38, %v1297_v42  ;;  %v1305_v51 = vand.u32 4294901760, %v1304_v47  ;;  %v1770_v55 = vsub.f32 %v1768_v50, %v1769_v53  ;;  %v1777_v58 = vand.u32 4294901760, %v1776_v56 }
  0x22   : > { %v355_v28 = vand.u32 4294901760, %v354_v25  ;;  %v827_v37 = vand.u32 4294901760, %v826_v32 }
  0x23   : > { %v1299_v49 = vand.u32 4294901760, %v1298_v45  ;;  %v1771_v57 = vand.u32 4294901760, %v1770_v55 }
  0x24   : > { %372 = vmatprep.subr.mxu1 %v355_v28  ;;  %356 = vmatprep.mubr.f32.mxu0 %v355_v28 }
  0x25   : > { %378 = vmatpush1.xpose.msra.mxu1 %v361_v26  ;;  %362 = vmatmul.mubr.f32.vlgmr.msra.gmra.mrb[0].mxu0 %v361_v26 }
  0x26   : > { %454 = vmatpush1.xpose.msra.mxu0 %v358_v15  ;;  %528 = vmatprep.subr.mxu1 %v285_v14 }
  0x27   : > { %519 = vmatprep.mubr.f32.mxu0 %v352_v17  ;;  %608 = vmatprep.subr.mxu0 %v353_v21 }
  0x28   : > { %444 = vmatmul.mubr.f32.vlgmr.msra.gmra.mrb[0].mxu1 %v287_v12 }
  0x29   : > { %530 = vmatpush1.xpose.msra.mxu1 %v287_v12  ;;  %522 = vmatmul.mubr.f32.vlgmr.msra.gmra.mrb[2].mxu0 %v358_v15 }
  0x2a   : > { %596 = vmatprep.mubr.f32.mxu1 %v353_v21  ;;  %612 = vmatpush1.xpose.msra.mxu0 %v359_v18 }
  0x2b   : > { %684 = vmatprep.subr.mxu1 %v285_v14  ;;  %676 = vmatprep.mubr.f32.mxu0 %v285_v14 }
  0x2c   : > { %600 = vmatmul.mubr.f32.vlgmr.msra.gmra.mrb[2].mxu1 %v359_v18  ;;  %758 = vmatprep.subr.mxu0 %v4313_v16 }
  0x2d   : > { %686 = vmatpush1.xpose.msra.mxu1 %v287_v12  ;;  %678 = vmatmul.mubr.f32.vlgmr.msra.gmra.mrb[4].mxu0 %v287_v12 }
  0x2e   : > { %750 = vmatprep.mubr.f32.mxu1 %v285_v14  ;;  %760 = vmatpush1.xpose.msra.mxu0 %v4318_v20 }
  0x2f   : > { %844 = vmatprep.subr.mxu1 %v827_v37  ;;  %828 = vmatprep.mubr.f32.mxu0 %v827_v37 }
  0x30   : > { %752 = vmatmul.mubr.f32.vlgmr.msra.gmra.mrb[4].mxu1 %v287_v12  ;;  %923 = vmatprep.subr.mxu0 %v824_v23 }
  0x31   : > { %850 = vmatpush1.xpose.msra.mxu1 %v833_v40  ;;  %834 = vmatmul.mubr.f32.vlgmr.msra.gmra.mrb[6].mxu0 %v833_v40 }
  0x32   : > { %914 = vmatprep.mubr.f32.mxu1 %v4313_v16  ;;  %926 = vmatpush1.xpose.msra.mxu0 %v830_v27 }
  0x33   : > { %1000 = vmatprep.subr.mxu1 %v4313_v16  ;;  %991 = vmatprep.mubr.f32.mxu0 %v824_v23 }
  0x34   : > { %916 = vmatmul.mubr.f32.vlgmr.msra.gmra.mrb[6].mxu1 %v4318_v20  ;;  %1080 = vmatprep.subr.mxu0 %v825_v29 }
  0x35   : > { %1002 = vmatpush1.xpose.msra.mxu1 %v4318_v20  ;;  %994 = vmatmul.mubr.f32.vlgmr.msra.gmra.mrb[8].mxu0 %v830_v27 }
  0x36   : > { %1068 = vmatprep.mubr.f32.mxu1 %v825_v29  ;;  %1084 = vmatpush1.xpose.msra.mxu0 %v831_v31 }
  0x37   : > { %1156 = vmatprep.subr.mxu1 %v4313_v16  ;;  %1148 = vmatprep.mubr.f32.mxu0 %v4313_v16 }
  0x38   : > { %1072 = vmatmul.mubr.f32.vlgmr.msra.gmra.mrb[8].mxu1 %v831_v31  ;;  %1230 = vmatprep.subr.mxu0 %v4322_v33 }
  0x39   : > { %1158 = vmatpush1.xpose.msra.mxu1 %v4318_v20  ;;  %1150 = vmatmul.mubr.f32.vlgmr.msra.gmra.mrb[10].mxu0 %v4318_v20 }
  0x3a   : > { %1222 = vmatprep.mubr.f32.mxu1 %v4313_v16  ;;  %1232 = vmatpush1.xpose.msra.mxu0 %v4324_v36 }
  0x3b   : > { %1316 = vmatprep.subr.mxu1 %v1299_v49  ;;  %1300 = vmatprep.mubr.f32.mxu0 %v1299_v49 }
  0x3c   : > { %1224 = vmatmul.mubr.f32.vlgmr.msra.gmra.mrb[10].mxu1 %v4318_v20  ;;  %1395 = vmatprep.subr.mxu0 %v1296_v38 }
  0x3d   : > { %1322 = vmatpush1.xpose.msra.mxu1 %v1305_v51  ;;  %1306 = vmatmul.mubr.f32.vlgmr.msra.gmra.mrb[12].mxu0 %v1305_v51 }
  0x3e   : > { %1386 = vmatprep.mubr.f32.mxu1 %v4322_v33  ;;  %1398 = vmatpush1.xpose.msra.mxu0 %v1302_v41 }
  0x3f   : > { %1472 = vmatprep.subr.mxu1 %v4322_v33  ;;  %1463 = vmatprep.mubr.f32.mxu0 %v1296_v38 }
  0x40   : > { %1388 = vmatmul.mubr.f32.vlgmr.msra.gmra.mrb[12].mxu1 %v4324_v36  ;;  %1552 = vmatprep.subr.mxu0 %v1297_v42 }
  0x41   : > { %1474 = vmatpush1.xpose.msra.mxu1 %v4324_v36  ;;  %1466 = vmatmul.mubr.f32.vlgmr.msra.gmra.mrb[14].mxu0 %v1302_v41 }
  0x42   : > { %1540 = vmatprep.mubr.f32.mxu1 %v1297_v42  ;;  %1556 = vmatpush1.xpose.msra.mxu0 %v1303_v44 }
  0x43   : > { %1628 = vmatprep.subr.mxu1 %v4322_v33  ;;  %1620 = vmatprep.mubr.f32.mxu0 %v4322_v33 }
  0x44   : > { %1544 = vmatmul.mubr.f32.vlgmr.msra.gmra.mrb[14].mxu1 %v1303_v44  ;;  %1702 = vmatprep.subr.mxu0 %v4332_v46 }
  0x45   : > { %1630 = vmatpush1.xpose.msra.mxu1 %v4324_v36  ;;  %1622 = vmatmul.mubr.f32.vlgmr.msra.gmra.mrb[16].mxu0 %v4324_v36 }
  0x46   : > { %1694 = vmatprep.mubr.f32.mxu1 %v4322_v33  ;;  %1704 = vmatpush1.xpose.msra.mxu0 %v4336_v48 }
  0x47   : > { %1788 = vmatprep.subr.mxu1 %v1771_v57  ;;  %1772 = vmatprep.mubr.f32.mxu0 %v1771_v57 }
  0x48   : > { %1696 = vmatmul.mubr.f32.vlgmr.msra.gmra.mrb[16].mxu1 %v4324_v36  ;;  %1867 = vmatprep.subr.mxu0 %v1768_v50 }
  0x49   : > { %1794 = vmatpush1.xpose.msra.mxu1 %v1777_v58  ;;  %1778 = vmatmul.mubr.f32.vlgmr.msra.gmra.mrb[18].mxu0 %v1777_v58 }
  0x4a   : > { %1858 = vmatprep.mubr.f32.mxu1 %v4332_v46  ;;  %1870 = vmatpush1.xpose.msra.mxu0 %v1774_v52 }
  0x4b   : > { %1944 = vmatprep.subr.mxu1 %v4332_v46  ;;  %1935 = vmatprep.mubr.f32.mxu0 %v1768_v50 }
  0x4c   : > { %1860 = vmatmul.mubr.f32.vlgmr.msra.gmra.mrb[18].mxu1 %v4336_v48  ;;  %2024 = vmatprep.subr.mxu0 %v1769_v53 }
  0x4d   : > { %1946 = vmatpush1.xpose.msra.mxu1 %v4336_v48  ;;  %1938 = vmatmul.mubr.f32.vlgmr.msra.gmra.mrb[20].mxu0 %v1774_v52 }
  0x4e   : > { %2012 = vmatprep.mubr.f32.mxu1 %v1769_v53  ;;  %2028 = vmatpush1.xpose.msra.mxu0 %v1775_v54 }
  0x4f   : > { %2100 = vmatprep.subr.mxu1 %v4332_v46  ;;  %2092 = vmatprep.mubr.f32.mxu0 %v4332_v46 }
  0x50   : > { %2016 = vmatmul.mubr.f32.vlgmr.msra.gmra.mrb[20].mxu1 %v1775_v54 }
  0x51   : > { %2102 = vmatpush1.xpose.msra.mxu1 %v4336_v48  ;;  %2094 = vmatmul.mubr.f32.vlgmr.msra.gmra.mrb[22].mxu0 %v4336_v48 }
  0x52   : > { %2166 = vmatprep.mubr.f32.mxu1 %v4332_v46 }
  0x54   : > { %2168 = vmatmul.mubr.f32.vlgmr.msra.gmra.mrb[22].mxu1 %v4336_v48 }
  0xf8   : > { %v363_v59 = vpop.f32.mrb[0].mxu0 }
  0xf9   : > { %v365_v60 = vpop.f32.mrb[1].mxu0 }
  0xfb   : > { %v445_v61 = vpop.f32.mrb[0].mxu1 }
  0xfc   : > { %v446_v62 = vadd.f32 %v445_v61, %v363_v59  ;;  %v447_v63 = vpop.f32.mrb[1].mxu1  ;;  %v523_v0 = vpop.f32.mrb[2].mxu0 }
  0xfd   : > { %v525_v1 = vpop.f32.mrb[3].mxu0 }
  0xfe   : > { %v524_v2 = vadd.f32 %v523_v0, %v446_v62  ;;  %v2173_v0 = vld [vmem:[%s4306_s17] sm:$0x3] }
  0xff   : > { %v601_v3 = vpop.f32.mrb[2].mxu1 }
 0x100   : > { %v602_v4 = vadd.f32 %v601_v3, %v524_v2  ;;  %v603_v5 = vpop.f32.mrb[3].mxu1  ;;  %v679_v6 = vpop.f32.mrb[4].mxu0 }
 0x101   : > { %v681_v7 = vpop.f32.mrb[5].mxu0 }
 0x102   : > { %v680_v8 = vadd.f32 %v679_v6, %v602_v4 }
 0x103   : > { %v753_v9 = vpop.f32.mrb[4].mxu1 }
 0x104   : > { %v754_v10 = vadd.f32 %v753_v9, %v680_v8  ;;  %v755_v11 = vpop.f32.mrb[5].mxu1  ;;  %v835_v12 = vpop.f32.mrb[6].mxu0 }
 0x105   : > { %v837_v13 = vpop.f32.mrb[7].mxu0 }
 0x106   : > { %v836_v14 = vadd.f32 %v835_v12, %v754_v10 }
 0x107   : > { %v917_v15 = vpop.f32.mrb[6].mxu1 }
 0x108   : > { %v918_v16 = vadd.f32 %v917_v15, %v836_v14  ;;  %v919_v17 = vpop.f32.mrb[7].mxu1  ;;  %v995_v18 = vpop.f32.mrb[8].mxu0 }
 0x109   : > { %v997_v19 = vpop.f32.mrb[9].mxu0 }
 0x10a   : > { %v996_v20 = vadd.f32 %v995_v18, %v918_v16 }
 0x10b   : > { %v1073_v21 = vpop.f32.mrb[8].mxu1 }
 0x10c   : > { %v1074_v22 = vadd.f32 %v1073_v21, %v996_v20  ;;  %v1075_v23 = vpop.f32.mrb[9].mxu1  ;;  %v1151_v24 = vpop.f32.mrb[10].mxu0 }
 0x10d   : > { %v1153_v25 = vpop.f32.mrb[11].mxu0 }
 0x10e   : > { %v1152_v26 = vadd.f32 %v1151_v24, %v1074_v22 }
 0x10f   : > { %v1225_v27 = vpop.f32.mrb[10].mxu1 }
 0x110   : > { %v1226_v28 = vadd.f32 %v1225_v27, %v1152_v26  ;;  %v1227_v29 = vpop.f32.mrb[11].mxu1  ;;  %v1307_v30 = vpop.f32.mrb[12].mxu0 }
 0x111   : > { %v1309_v31 = vpop.f32.mrb[13].mxu0 }
 0x112   : > { %v1308_v32 = vadd.f32 %v1307_v30, %v1226_v28 }
 0x113   : > { %v1389_v33 = vpop.f32.mrb[12].mxu1 }
 0x114   : > { %v1390_v34 = vadd.f32 %v1389_v33, %v1308_v32  ;;  %v1391_v35 = vpop.f32.mrb[13].mxu1  ;;  %v1467_v36 = vpop.f32.mrb[14].mxu0 }
 0x115   : > { %v1469_v37 = vpop.f32.mrb[15].mxu0 }
 0x116   : > { %v1468_v38 = vadd.f32 %v1467_v36, %v1390_v34 }
 0x117   : > { %v1545_v39 = vpop.f32.mrb[14].mxu1 }
 0x118   : > { %v1546_v40 = vadd.f32 %v1545_v39, %v1468_v38  ;;  %v1547_v41 = vpop.f32.mrb[15].mxu1  ;;  %v1623_v42 = vpop.f32.mrb[16].mxu0 }
 0x119   : > { %v1625_v43 = vpop.f32.mrb[17].mxu0 }
 0x11a   : > { %v1624_v44 = vadd.f32 %v1623_v42, %v1546_v40 }
 0x11b   : > { %v1697_v45 = vpop.f32.mrb[16].mxu1 }
 0x11c   : > { %v1698_v46 = vadd.f32 %v1697_v45, %v1624_v44  ;;  %v1699_v47 = vpop.f32.mrb[17].mxu1  ;;  %v1779_v48 = vpop.f32.mrb[18].mxu0 }
 0x11d   : > { %v1781_v49 = vpop.f32.mrb[19].mxu0 }
 0x11e   : > { %v1780_v50 = vadd.f32 %v1779_v48, %v1698_v46 }
 0x11f   : > { %v1861_v51 = vpop.f32.mrb[18].mxu1 }
 0x120   : > { %v1862_v52 = vadd.f32 %v1861_v51, %v1780_v50  ;;  %v1863_v53 = vpop.f32.mrb[19].mxu1  ;;  %v1939_v54 = vpop.f32.mrb[20].mxu0 }
 0x121   : > { %v1941_v55 = vpop.f32.mrb[21].mxu0 }
 0x122   : > { %v1940_v56 = vadd.f32 %v1939_v54, %v1862_v52 }
 0x123   : > { %v2017_v57 = vpop.f32.mrb[20].mxu1 }
 0x124   : > { %v2018_v58 = vadd.f32 %v2017_v57, %v1940_v56  ;;  %v2019_v59 = vpop.f32.mrb[21].mxu1  ;;  %v2095_v60 = vpop.f32.mrb[22].mxu0 }
 0x125   : > { %v2097_v61 = vpop.f32.mrb[23].mxu0 }
 0x126   : > { %v2096_v62 = vadd.f32 %v2095_v60, %v2018_v58 }
 0x127   : > { %v2169_v63 = vpop.f32.mrb[22].mxu1 }
 0x128   : > { %v2170_v1 = vadd.f32 %v2169_v63, %v2096_v62  ;;  %v2171_v2 = vpop.f32.mrb[23].mxu1 }
 0x12a   : > { %v2174_v3 = vadd.f32 %v2173_v0, %v2170_v1 }
 0x12c   : > { %2176 = vst.msk [vmem:[%s4306_s17] sm:$0x3] %vm231_vm0, %v2174_v3 }
 0x12d PF: > { %p2177_p6 = scmp.eq.s32.totalorder %s4252_s9, 1 }
 0x12e   : > { %v2190_v4 = vlaneseq (%p2177_p6)  ;;  %v4264_v5 = vmov (%p2177_p6), 1983009808   ;;  %v2182_v7 = vld [vmem:[%s4447_s1] sm:$0xff] (%p2177_p6)  ;;  %v2183_v22 = vld [vmem:[%s4447_s1 + $0x8] sm:$0xff] (%p2177_p6) }
 0x12f   : > { %2181 = sbr.rel (!%p2177_p6) target bundleno = 588 (0x24c), region = 40  ;;  %v2188_v6 = vunpack.c.l.s4 (%p2177_p6), %v4264_v5  ;;  %v2186_v10 = vcombine.high (%p2177_p6), %v2182_v7, %v2182_v7  ;;  %v2203_v37 = vcombine.high (%p2177_p6), %v2183_v22, %v2183_v22 }
 0x130   : > { %v2191_v8 = vshrl.u32 (%p2177_p6), %v2190_v4, 7 }
 0x131   : > { %v2189_v9 = vunpack.c.0.s8 (%p2177_p6), %v2188_v6 }
 0x133   : > { %v2192_v11 = vsub.s32 (%p2177_p6), %v2189_v9, %v2191_v8 }
 0x135   : > { %v2193_v12 = vrot.slane (%p2177_p6), %v2182_v7, %v2192_v11  ;;  %v2200_v13 = vrot.slane (%p2177_p6), %v2186_v10, %v2192_v11  ;;  %v2210_v27 = vrot.slane (%p2177_p6), %v2183_v22, %v2192_v11  ;;  %v2217_v42 = vrot.slane (%p2177_p6), %v2203_v37, %v2192_v11 }
 0x137   : > { %v2201_v14 = vcombine.high %v2193_v12, %v2193_v12  ;;  %v2230_v15 = vand.u32 4294901760, %v2193_v12  ;;  %v2202_v16 = vcombine.high %v2200_v13, %v2200_v13  ;;  %v4382_v23 = vand.u32 4294901760, %v2200_v13 }
 0x138   : > { %v2218_v33 = vcombine.high %v2210_v27, %v2210_v27  ;;  %v4388_v39 = vand.u32 4294901760, %v2210_v27  ;;  %v2219_v46 = vcombine.high %v2217_v42, %v2217_v42  ;;  %v4400_v51 = vand.u32 4294901760, %v2217_v42 }
 0x139   : > { %v2228_v17 = vand.u32 4294901760, %v2201_v14  ;;  %v2301_v18 = vsub.f32 %v2193_v12, %v2230_v15  ;;  %v4377_v19 = vand.u32 4294901760, %v2202_v16  ;;  %v2773_v30 = vsub.f32 %v2200_v13, %v4382_v23 }
 0x13a   : > { %v4386_v36 = vand.u32 4294901760, %v2218_v33  ;;  %v3245_v44 = vsub.f32 %v2210_v27, %v4388_v39  ;;  %v4396_v49 = vand.u32 4294901760, %v2219_v46  ;;  %v3717_v55 = vsub.f32 %v2217_v42, %v4400_v51 }
 0x13b   : > { %2229 = vmatprep.subr.mxu0 %v2228_v17  ;;  %v2295_v20 = vsub.f32 %v2201_v14, %v2228_v17  ;;  %v2302_v21 = vand.u32 4294901760, %v2301_v18  ;;  %2385 = vmatprep.mubr.f32.mxu1 %v2228_v17  ;;  %v2767_v26 = vsub.f32 %v2202_v16, %v4377_v19  ;;  %v2774_v34 = vand.u32 4294901760, %v2773_v30 }
 0x13c   : > { %2231 = vmatpush1.xpose.msra.mxu0 %v2230_v15  ;;  %v3239_v41 = vsub.f32 %v2218_v33, %v4386_v36  ;;  %v3246_v47 = vand.u32 4294901760, %v3245_v44  ;;  %v3711_v53 = vsub.f32 %v2219_v46, %v4396_v49  ;;  %v3718_v57 = vand.u32 4294901760, %v3717_v55 }
 0x13d   : > { %v2296_v24 = vand.u32 4294901760, %v2295_v20  ;;  %v2303_v25 = vsub.f32 %v2301_v18, %v2302_v21  ;;  %2394 = vmatprep.subr.mxu0 %v2295_v20  ;;  %v2768_v32 = vand.u32 4294901760, %v2767_v26  ;;  %v2775_v38 = vsub.f32 %v2773_v30, %v2774_v34 }
 0x13e   : > { %v3240_v45 = vand.u32 4294901760, %v3239_v41  ;;  %v3247_v50 = vsub.f32 %v3245_v44, %v3246_v47  ;;  %v3712_v56 = vand.u32 4294901760, %v3711_v53  ;;  %v3719_v59 = vsub.f32 %v3717_v55, %v3718_v57 }
 0x13f   : > { %v2297_v28 = vsub.f32 %v2295_v20, %v2296_v24  ;;  %v2304_v29 = vand.u32 4294901760, %v2303_v25  ;;  %v2769_v35 = vsub.f32 %v2767_v26, %v2768_v32  ;;  %v2776_v43 = vand.u32 4294901760, %v2775_v38 }
 0x140   : > { %v3241_v48 = vsub.f32 %v3239_v41, %v3240_v45  ;;  %v3248_v54 = vand.u32 4294901760, %v3247_v50  ;;  %v3713_v58 = vsub.f32 %v3711_v53, %v3712_v56  ;;  %v3720_v61 = vand.u32 4294901760, %v3719_v59 }
 0x141   : > { %v2298_v31 = vand.u32 4294901760, %v2297_v28  ;;  %v2770_v40 = vand.u32 4294901760, %v2769_v35 }
 0x142   : > { %v3242_v52 = vand.u32 4294901760, %v3241_v48  ;;  %v3714_v60 = vand.u32 4294901760, %v3713_v58 }
 0x143   : > { %2315 = vmatprep.subr.mxu1 %v2298_v31  ;;  %2299 = vmatprep.mubr.f32.mxu0 %v2298_v31 }
 0x144   : > { %2321 = vmatpush1.xpose.msra.mxu1 %v2304_v29  ;;  %2305 = vmatmul.mubr.f32.vlgmr.msra.gmra.mrb[0].mxu0 %v2304_v29 }
 0x145   : > { %2397 = vmatpush1.xpose.msra.mxu0 %v2301_v18  ;;  %2471 = vmatprep.subr.mxu1 %v2228_v17 }
 0x146   : > { %2462 = vmatprep.mubr.f32.mxu0 %v2295_v20  ;;  %2551 = vmatprep.subr.mxu0 %v2296_v24 }
 0x147   : > { %2387 = vmatmul.mubr.f32.vlgmr.msra.gmra.mrb[0].mxu1 %v2230_v15 }
 0x148   : > { %2473 = vmatpush1.xpose.msra.mxu1 %v2230_v15  ;;  %2465 = vmatmul.mubr.f32.vlgmr.msra.gmra.mrb[2].mxu0 %v2301_v18 }
 0x149   : > { %2539 = vmatprep.mubr.f32.mxu1 %v2296_v24  ;;  %2555 = vmatpush1.xpose.msra.mxu0 %v2302_v21 }
 0x14a   : > { %2627 = vmatprep.subr.mxu1 %v2228_v17  ;;  %2619 = vmatprep.mubr.f32.mxu0 %v2228_v17 }
 0x14b   : > { %2543 = vmatmul.mubr.f32.vlgmr.msra.gmra.mrb[2].mxu1 %v2302_v21  ;;  %2701 = vmatprep.subr.mxu0 %v4377_v19 }
 0x14c   : > { %2629 = vmatpush1.xpose.msra.mxu1 %v2230_v15  ;;  %2621 = vmatmul.mubr.f32.vlgmr.msra.gmra.mrb[4].mxu0 %v2230_v15 }
 0x14d   : > { %2693 = vmatprep.mubr.f32.mxu1 %v2228_v17  ;;  %2703 = vmatpush1.xpose.msra.mxu0 %v4382_v23 }
 0x14e   : > { %2787 = vmatprep.subr.mxu1 %v2770_v40  ;;  %2771 = vmatprep.mubr.f32.mxu0 %v2770_v40 }
 0x14f   : > { %2695 = vmatmul.mubr.f32.vlgmr.msra.gmra.mrb[4].mxu1 %v2230_v15  ;;  %2866 = vmatprep.subr.mxu0 %v2767_v26 }
 0x150   : > { %2793 = vmatpush1.xpose.msra.mxu1 %v2776_v43  ;;  %2777 = vmatmul.mubr.f32.vlgmr.msra.gmra.mrb[6].mxu0 %v2776_v43 }
 0x151   : > { %2857 = vmatprep.mubr.f32.mxu1 %v4377_v19  ;;  %2869 = vmatpush1.xpose.msra.mxu0 %v2773_v30 }
 0x152   : > { %2943 = vmatprep.subr.mxu1 %v4377_v19  ;;  %2934 = vmatprep.mubr.f32.mxu0 %v2767_v26 }
 0x153   : > { %2859 = vmatmul.mubr.f32.vlgmr.msra.gmra.mrb[6].mxu1 %v4382_v23  ;;  %3023 = vmatprep.subr.mxu0 %v2768_v32 }
 0x154   : > { %2945 = vmatpush1.xpose.msra.mxu1 %v4382_v23  ;;  %2937 = vmatmul.mubr.f32.vlgmr.msra.gmra.mrb[8].mxu0 %v2773_v30 }
 0x155   : > { %3011 = vmatprep.mubr.f32.mxu1 %v2768_v32  ;;  %3027 = vmatpush1.xpose.msra.mxu0 %v2774_v34 }
 0x156   : > { %3099 = vmatprep.subr.mxu1 %v4377_v19  ;;  %3091 = vmatprep.mubr.f32.mxu0 %v4377_v19 }
 0x157   : > { %3015 = vmatmul.mubr.f32.vlgmr.msra.gmra.mrb[8].mxu1 %v2774_v34  ;;  %3173 = vmatprep.subr.mxu0 %v4386_v36 }
 0x158   : > { %3101 = vmatpush1.xpose.msra.mxu1 %v4382_v23  ;;  %3093 = vmatmul.mubr.f32.vlgmr.msra.gmra.mrb[10].mxu0 %v4382_v23 }
 0x159   : > { %3165 = vmatprep.mubr.f32.mxu1 %v4377_v19  ;;  %3175 = vmatpush1.xpose.msra.mxu0 %v4388_v39 }
 0x15a   : > { %3259 = vmatprep.subr.mxu1 %v3242_v52  ;;  %3243 = vmatprep.mubr.f32.mxu0 %v3242_v52 }
 0x15b   : > { %3167 = vmatmul.mubr.f32.vlgmr.msra.gmra.mrb[10].mxu1 %v4382_v23  ;;  %3338 = vmatprep.subr.mxu0 %v3239_v41 }
 0x15c   : > { %3265 = vmatpush1.xpose.msra.mxu1 %v3248_v54  ;;  %3249 = vmatmul.mubr.f32.vlgmr.msra.gmra.mrb[12].mxu0 %v3248_v54 }
 0x15d   : > { %3329 = vmatprep.mubr.f32.mxu1 %v4386_v36  ;;  %3341 = vmatpush1.xpose.msra.mxu0 %v3245_v44 }
 0x15e   : > { %3415 = vmatprep.subr.mxu1 %v4386_v36  ;;  %3406 = vmatprep.mubr.f32.mxu0 %v3239_v41 }
 0x15f   : > { %3331 = vmatmul.mubr.f32.vlgmr.msra.gmra.mrb[12].mxu1 %v4388_v39  ;;  %3495 = vmatprep.subr.mxu0 %v3240_v45 }
 0x160   : > { %3417 = vmatpush1.xpose.msra.mxu1 %v4388_v39  ;;  %3409 = vmatmul.mubr.f32.vlgmr.msra.gmra.mrb[14].mxu0 %v3245_v44 }
 0x161   : > { %3483 = vmatprep.mubr.f32.mxu1 %v3240_v45  ;;  %3499 = vmatpush1.xpose.msra.mxu0 %v3246_v47 }
 0x162   : > { %3571 = vmatprep.subr.mxu1 %v4386_v36  ;;  %3563 = vmatprep.mubr.f32.mxu0 %v4386_v36 }
 0x163   : > { %3487 = vmatmul.mubr.f32.vlgmr.msra.gmra.mrb[14].mxu1 %v3246_v47  ;;  %3645 = vmatprep.subr.mxu0 %v4396_v49 }
 0x164   : > { %3573 = vmatpush1.xpose.msra.mxu1 %v4388_v39  ;;  %3565 = vmatmul.mubr.f32.vlgmr.msra.gmra.mrb[16].mxu0 %v4388_v39 }
 0x165   : > { %3637 = vmatprep.mubr.f32.mxu1 %v4386_v36  ;;  %3647 = vmatpush1.xpose.msra.mxu0 %v4400_v51 }
 0x166   : > { %3731 = vmatprep.subr.mxu1 %v3714_v60  ;;  %3715 = vmatprep.mubr.f32.mxu0 %v3714_v60 }
 0x167   : > { %3639 = vmatmul.mubr.f32.vlgmr.msra.gmra.mrb[16].mxu1 %v4388_v39  ;;  %3810 = vmatprep.subr.mxu0 %v3711_v53 }
 0x168   : > { %3737 = vmatpush1.xpose.msra.mxu1 %v3720_v61  ;;  %3721 = vmatmul.mubr.f32.vlgmr.msra.gmra.mrb[18].mxu0 %v3720_v61 }
 0x169   : > { %3801 = vmatprep.mubr.f32.mxu1 %v4396_v49  ;;  %3813 = vmatpush1.xpose.msra.mxu0 %v3717_v55 }
 0x16a   : > { %3887 = vmatprep.subr.mxu1 %v4396_v49  ;;  %3878 = vmatprep.mubr.f32.mxu0 %v3711_v53 }
 0x16b   : > { %3803 = vmatmul.mubr.f32.vlgmr.msra.gmra.mrb[18].mxu1 %v4400_v51  ;;  %3967 = vmatprep.subr.mxu0 %v3712_v56 }
 0x16c   : > { %3889 = vmatpush1.xpose.msra.mxu1 %v4400_v51  ;;  %3881 = vmatmul.mubr.f32.vlgmr.msra.gmra.mrb[20].mxu0 %v3717_v55 }
 0x16d   : > { %3955 = vmatprep.mubr.f32.mxu1 %v3712_v56  ;;  %3971 = vmatpush1.xpose.msra.mxu0 %v3718_v57 }
 0x16e   : > { %4043 = vmatprep.subr.mxu1 %v4396_v49  ;;  %4035 = vmatprep.mubr.f32.mxu0 %v4396_v49 }
 0x16f   : > { %3959 = vmatmul.mubr.f32.vlgmr.msra.gmra.mrb[20].mxu1 %v3718_v57 }
 0x170   : > { %4045 = vmatpush1.xpose.msra.mxu1 %v4400_v51  ;;  %4037 = vmatmul.mubr.f32.vlgmr.msra.gmra.mrb[22].mxu0 %v4400_v51 }
 0x171   : > { %4109 = vmatprep.mubr.f32.mxu1 %v4396_v49 }
 0x173   : > { %4111 = vmatmul.mubr.f32.vlgmr.msra.gmra.mrb[22].mxu1 %v4400_v51 }
 0x217   : > { %v2306_v62 = vpop.f32.mrb[0].mxu0 }
 0x218   : > { %v2308_v63 = vpop.f32.mrb[1].mxu0 }
 0x21a   : > { %v2388_v0 = vpop.f32.mrb[0].mxu1 }
 0x21b   : > { %v2389_v1 = vadd.f32 %v2388_v0, %v2306_v62  ;;  %v2390_v2 = vpop.f32.mrb[1].mxu1  ;;  %v2466_v3 = vpop.f32.mrb[2].mxu0 }
 0x21c   : > { %v2468_v4 = vpop.f32.mrb[3].mxu0 }
 0x21d   : > { %v2467_v5 = vadd.f32 %v2466_v3, %v2389_v1  ;;  %v4116_v3 = vld [vmem:[%s4306_s17] sm:$0x3] }
 0x21e   : > { %v2544_v6 = vpop.f32.mrb[2].mxu1 }
 0x21f   : > { %v2545_v7 = vadd.f32 %v2544_v6, %v2467_v5  ;;  %v2546_v8 = vpop.f32.mrb[3].mxu1  ;;  %v2622_v9 = vpop.f32.mrb[4].mxu0 }
 0x220   : > { %v2624_v10 = vpop.f32.mrb[5].mxu0 }
 0x221   : > { %v2623_v11 = vadd.f32 %v2622_v9, %v2545_v7 }
 0x222   : > { %v2696_v12 = vpop.f32.mrb[4].mxu1 }
 0x223   : > { %v2697_v13 = vadd.f32 %v2696_v12, %v2623_v11  ;;  %v2698_v14 = vpop.f32.mrb[5].mxu1  ;;  %v2778_v15 = vpop.f32.mrb[6].mxu0 }
 0x224   : > { %v2780_v16 = vpop.f32.mrb[7].mxu0 }
 0x225   : > { %v2779_v17 = vadd.f32 %v2778_v15, %v2697_v13 }
 0x226   : > { %v2860_v18 = vpop.f32.mrb[6].mxu1 }
 0x227   : > { %v2861_v19 = vadd.f32 %v2860_v18, %v2779_v17  ;;  %v2862_v20 = vpop.f32.mrb[7].mxu1  ;;  %v2938_v21 = vpop.f32.mrb[8].mxu0 }
 0x228   : > { %v2940_v22 = vpop.f32.mrb[9].mxu0 }
 0x229   : > { %v2939_v23 = vadd.f32 %v2938_v21, %v2861_v19 }
 0x22a   : > { %v3016_v24 = vpop.f32.mrb[8].mxu1 }
 0x22b   : > { %v3017_v25 = vadd.f32 %v3016_v24, %v2939_v23  ;;  %v3018_v26 = vpop.f32.mrb[9].mxu1  ;;  %v3094_v27 = vpop.f32.mrb[10].mxu0 }
 0x22c   : > { %v3096_v28 = vpop.f32.mrb[11].mxu0 }
 0x22d   : > { %v3095_v29 = vadd.f32 %v3094_v27, %v3017_v25 }
 0x22e   : > { %v3168_v30 = vpop.f32.mrb[10].mxu1 }
 0x22f   : > { %v3169_v31 = vadd.f32 %v3168_v30, %v3095_v29  ;;  %v3170_v32 = vpop.f32.mrb[11].mxu1  ;;  %v3250_v33 = vpop.f32.mrb[12].mxu0 }
 0x230   : > { %v3252_v34 = vpop.f32.mrb[13].mxu0 }
 0x231   : > { %v3251_v35 = vadd.f32 %v3250_v33, %v3169_v31 }
 0x232   : > { %v3332_v36 = vpop.f32.mrb[12].mxu1 }
 0x233   : > { %v3333_v37 = vadd.f32 %v3332_v36, %v3251_v35  ;;  %v3334_v38 = vpop.f32.mrb[13].mxu1  ;;  %v3410_v39 = vpop.f32.mrb[14].mxu0 }
 0x234   : > { %v3412_v40 = vpop.f32.mrb[15].mxu0 }
 0x235   : > { %v3411_v41 = vadd.f32 %v3410_v39, %v3333_v37 }
 0x236   : > { %v3488_v42 = vpop.f32.mrb[14].mxu1 }
 0x237   : > { %v3489_v43 = vadd.f32 %v3488_v42, %v3411_v41  ;;  %v3490_v44 = vpop.f32.mrb[15].mxu1  ;;  %v3566_v45 = vpop.f32.mrb[16].mxu0 }
 0x238   : > { %v3568_v46 = vpop.f32.mrb[17].mxu0 }
 0x239   : > { %v3567_v47 = vadd.f32 %v3566_v45, %v3489_v43 }
 0x23a   : > { %v3640_v48 = vpop.f32.mrb[16].mxu1 }
 0x23b   : > { %v3641_v49 = vadd.f32 %v3640_v48, %v3567_v47  ;;  %v3642_v50 = vpop.f32.mrb[17].mxu1  ;;  %v3722_v51 = vpop.f32.mrb[18].mxu0 }
 0x23c   : > { %v3724_v52 = vpop.f32.mrb[19].mxu0 }
 0x23d   : > { %v3723_v53 = vadd.f32 %v3722_v51, %v3641_v49 }
 0x23e   : > { %v3804_v54 = vpop.f32.mrb[18].mxu1 }
 0x23f   : > { %v3805_v55 = vadd.f32 %v3804_v54, %v3723_v53  ;;  %v3806_v56 = vpop.f32.mrb[19].mxu1  ;;  %v3882_v57 = vpop.f32.mrb[20].mxu0 }
 0x240   : > { %v3884_v58 = vpop.f32.mrb[21].mxu0 }
 0x241   : > { %v3883_v59 = vadd.f32 %v3882_v57, %v3805_v55 }
 0x242   : > { %v3960_v60 = vpop.f32.mrb[20].mxu1 }
 0x243   : > { %v3961_v61 = vadd.f32 %v3960_v60, %v3883_v59  ;;  %v3962_v62 = vpop.f32.mrb[21].mxu1  ;;  %v4038_v63 = vpop.f32.mrb[22].mxu0 }
 0x244   : > { %v4040_v0 = vpop.f32.mrb[23].mxu0 }
 0x245   : > { %v4039_v1 = vadd.f32 %v4038_v63, %v3961_v61 }
 0x246   : > { %v4112_v2 = vpop.f32.mrb[22].mxu1 }
 0x247   : > { %v4113_v4 = vadd.f32 %v4112_v2, %v4039_v1  ;;  %v4114_v5 = vpop.f32.mrb[23].mxu1 }
 0x249   : > { %v4117_v6 = vadd.f32 %v4116_v3, %v4113_v4 }
 0x24b   : > { %4119 = vst.msk [vmem:[%s4306_s17] sm:$0x3] %vm231_vm0, %v4117_v6 }
 0x24c PF: > { %s12_s11 = sadd.s32 1, %s4260_s11   ;;  %s4449_s9 = smov %s4256_s10 }
 0x24d   : > { %p9_p7 = scmp.ge.s32.totalorder %s12_s11, 4   ;;  %s4450_s10 = smov %s4452_s12 }
 0x24f   :  { %11 = sbr.rel (!%p9_p7) target bundleno = 2 (0x2), region = 73 }

</bundles_post_ra>
